<compile_context>
chip_gen: v6e
topology: v6e:2x2x1
jax: 0.10.0
libtpu: 0.0.40
codegen_flags: <defaults>
</compile_context>

<pallas_src>
import jax
import jax.numpy as jnp
from jax.experimental import pallas as pl
from jax.experimental.pallas import tpu as pltpu

PRIMITIVES = ["lin_a", "lin_b", "one-hot", "lin_c"]
ONE_HOT_IDX = PRIMITIVES.index("one-hot")


def _round_up(x, m):
    return ((x + m - 1) // m) * m


# ---------------------------------------------------------------------------
# Fused kernel. Grid = (row tile i, out-col tile j, contraction tile k):
#   out_{i,j} += mask_{i,k} @ H_{k,j}        (int8 mask upcast in-kernel, f32 acc)
#   epilogue (last k): out_{i,j} += sum_{w_i<=0} w_i
# Output block index depends only on (i, j) -> resident f32 accumulator over k.
# ---------------------------------------------------------------------------
def _mixed_op_kernel(neg_ref, mask_ref, h_ref, o_ref):
    k = pl.program_id(2)

    @pl.when(k == 0)
    def _():
        o_ref[...] = jnp.zeros_like(o_ref)

    # int8 -> bf16 upcast on the VPU (hidden under the mask DMA), MXU matmul
    # with f32 accumulation into the resident output block.
    o_ref[...] += jnp.dot(mask_ref[...].astype(h_ref.dtype), h_ref[...],
                          preferred_element_type=jnp.float32)

    @pl.when(k == pl.num_programs(2) - 1)
    def _():
        o_ref[...] += neg_ref[0]  # scalar broadcast of pruned (w_i <= 0) weights


def mixed_op_forward(mask_matrix, x, one_hot_h, weights, op_weights,
                     *, compute_dtype=jnp.bfloat16, mask_store_dtype=jnp.int8):
    """Pallas equivalent of MixedOp.forward.

    mask_matrix : [N, N]  dense 0/1 float (stand-in for torch.spmm's sparse mask;
                  pass mask_store_dtype=jnp.bfloat16/f32 if the mask is not binary)
    x           : [N, in_dim]
    one_hot_h   : [N, out_dim]
    weights     : [num_ops] architecture weights
    op_weights  : list of [in_dim, out_dim] (entry at ONE_HOT_IDX is ignored)
    """
    n, in_dim = x.shape
    d = one_hot_h.shape[1]
    num_ops = weights.shape[0]
    assert mask_matrix.shape == (n, n)
    assert len(op_weights) == num_ops

    # ---- fold architecture weights (tiny, plain JAX) -------------------------
    w32 = weights.astype(jnp.float32)
    pos_w = jnp.maximum(w32, 0.0)                       # gate: w_i > 0 path
    neg_sum = jnp.sum(jnp.minimum(w32, 0.0)).reshape(1)  # scalar path: w_i <= 0
    lin_gate = jnp.array(
        [0.0 if i == ONE_HOT_IDX else 1.0 for i in range(num_ops)],
        dtype=jnp.float32)
    w_all = jnp.stack([w.astype(jnp.float32) for w in op_weights], axis=0)
    w_comb = jnp.einsum("i,iod->od", pos_w * lin_gate, w_all)   # [in_dim, d]

    # ---- hoist H = x @ W_comb + relu(w_onehot) * one_hot (once, plain XLA) ----
    h = (x.astype(jnp.float32) @ w_comb
         + pos_w[ONE_HOT_IDX] * one_hot_h.astype(jnp.float32))

    # ---- tiling: rows i (parallel) x out-cols j (parallel) x mask-cols k ------
    tk = 512 if n >= 512 else (256 if n >= 256 else 128)      # lane dim, /128
    n_pad = _round_up(n, tk)                                  # tk | n_pad
    tm = 512 if n_pad >= 1024 else min(256, n_pad)            # multiple of 16
    if n_pad // tm < 2 and n_pad >= 256:
        tm = n_pad // 2          # guarantee >= 2 parallel row tiles (v7x megacore)
    d_pad = _round_up(max(d, 128), 128)                       # lane-dense output
    tn = 512 if d_pad % 512 == 0 else (256 if d_pad % 256 == 0 else 128)
    grid = (n_pad // tm, d_pad // tn, n_pad // tk)

    # ---- pad & cast: mask -> int8 (exact for 0/1), H -> bf16 ------------------
    mask_p = jnp.pad(mask_matrix, ((0, n_pad - n), (0, n_pad - n)))
    mask_p = mask_p.astype(mask_store_dtype)
    h_p = jnp.pad(h, ((0, n_pad - n), (0, d_pad - d))).astype(compute_dtype)

    # VMEM footprint (double-buffered mask + H tiles, resident f32 accumulator)
    # is a few MiB at most -> leave the default scoped-VMEM limit on all gens.
    cost = pl.CostEstimate(
        flops=2 * n_pad * n_pad * d_pad,
        transcendentals=0,
        bytes_accessed=(n_pad * n_pad * mask_p.dtype.itemsize
                        + n_pad * d_pad * h_p.dtype.itemsize
                        + n_pad * d_pad * 4))

    out = pl.pallas_call(
        _mixed_op_kernel,
        out_shape=jax.ShapeDtypeStruct((n_pad, d_pad), jnp.float32),
        grid_spec=pltpu.PrefetchScalarGridSpec(
            num_scalar_prefetch=1,                                   # neg_sum -> SMEM
            grid=grid,
            in_specs=[
                pl.BlockSpec((tm, tk), lambda i, j, k, s: (i, k)),   # mask tile (int8)
                pl.BlockSpec((tk, tn), lambda i, j, k, s: (k, j)),   # H tile (bf16)
            ],
            out_specs=pl.BlockSpec((tm, tn), lambda i, j, k, s: (i, j)),
        ),
        compiler_params=pltpu.CompilerParams(
            dimension_semantics=("parallel", "parallel", "arbitrary")),
        cost_estimate=cost,
    )(neg_sum, mask_p, h_p)

    return out[:n, :d]


# ---------------------------------------------------------------------------
if __name__ == "__main__":
    key = jax.random.PRNGKey(0)
    k_mask, k_x, k_w0, k_w1, k_w3 = jax.random.split(key, 5)

    N, IN_DIM, OUT_DIM = 16, 16, 32
    NUM_OPS = len(PRIMITIVES)

    # Dense 0/1 mask (stand-in for the sparse mask_matrix of torch.spmm).
    mask_matrix = (jax.random.uniform(k_mask, (N, N)) < 0.3).astype(jnp.float32)
    x = jax.random.normal(k_x, (N, IN_DIM), dtype=jnp.float32)
    one_hot_h = jax.nn.one_hot(jnp.arange(N) % OUT_DIM, OUT_DIM,
                               dtype=jnp.float32)

    # Deterministic per-op linear weights (one-hot slot gets a dummy).
    op_weights = [
        0.1 * jax.random.normal(k_w0, (IN_DIM, OUT_DIM), dtype=jnp.float32),
        0.1 * jax.random.normal(k_w1, (IN_DIM, OUT_DIM), dtype=jnp.float32),
        jnp.zeros((IN_DIM, OUT_DIM), dtype=jnp.float32),  # 'one-hot' placeholder
        0.1 * jax.random.normal(k_w3, (IN_DIM, OUT_DIM), dtype=jnp.float32),
    ]

    # Architecture weights: exercise both branches (w > 0 and w <= 0).
    weights = jnp.array([0.6, 0.0, 0.3, -0.2], dtype=jnp.float32)

    out = mixed_op_forward(mask_matrix, x, one_hot_h, weights, op_weights)
    out = jax.block_until_ready(out)

    # Pure-JAX f32 reference mirroring the torch loop.
    ref = jnp.zeros((N, OUT_DIM), dtype=jnp.float32)
    for i in range(NUM_OPS):
        w = float(weights[i])
        if w > 0:
            h_i = one_hot_h if i == ONE_HOT_IDX else x @ op_weights[i]
            ref = ref + w * (mask_matrix @ h_i)
        else:
            ref = ref + w

    assert out.shape == (N, OUT_DIM)
    # H is streamed to the MXU in bf16 -> wider tolerance than pure f32
    # (the int8 0/1 mask itself is exact).
    assert jnp.allclose(out, ref, atol=3e-2, rtol=3e-2), "mismatch vs reference"
    print("KERNEL_OK")
</pallas_src>

<mosaic_0001>
module attributes {stable_mosaic.version = 11 : i64} {
  func.func @_mixed_op_kernel(%arg0: i32, %arg1: i32, %arg2: i32, %arg3: memref<1xf32, #tpu.memory_space<smem>>, %arg4: memref<128x128xi8, #tpu.memory_space<vmem>>, %arg5: memref<128x128xbf16, #tpu.memory_space<vmem>>, %arg6: memref<128x128xf32, #tpu.memory_space<vmem>>) attributes {dimension_semantics = [#tpu.dimension_semantics<parallel>, #tpu.dimension_semantics<parallel>, #tpu.dimension_semantics<arbitrary>], iteration_bounds = array<i64: 1, 1, 1>, scalar_prefetch = 1 : i64, scratch_operands = 0 : i64, tpu.core_type = #tpu.core_type<tc>, window_params = [{transform_indices = @transform_0, window_bounds = array<i64: 128, 128>}, {transform_indices = @transform_1, window_bounds = array<i64: 128, 128>}, {transform_indices = @transform_2, window_bounds = array<i64: 128, 128>}]} {
    %c0_i32 = arith.constant 0 : i32
    %0 = arith.cmpi eq, %arg2, %c0_i32 : i32
    %1 = arith.extui %0 : i1 to i32
    %c0_i32_0 = arith.constant 0 : i32
    %2 = arith.cmpi ne, %1, %c0_i32_0 : i32
    scf.if %2 {
      %cst_10 = arith.constant 0.000000e+00 : f32
      %13 = vector.broadcast %cst_10 : f32 to vector<128x128xf32>
      %c0_11 = arith.constant 0 : index
      %c0_12 = arith.constant 0 : index
      %14 = vector.load %arg6[%c0_11, %c0_12] : memref<128x128xf32, #tpu.memory_space<vmem>>, vector<128x128xf32>
      tpu.vector_store %arg6[%c0_11, %c0_12], %13 {strides = array<i32>} : memref<128x128xf32, #tpu.memory_space<vmem>>, vector<128x128xf32>,
    } else {
    }
    %c0 = arith.constant 0 : index
    %c0_1 = arith.constant 0 : index
    %3 = vector.load %arg6[%c0, %c0_1] : memref<128x128xf32, #tpu.memory_space<vmem>>, vector<128x128xf32>
    %c0_2 = arith.constant 0 : index
    %c0_3 = arith.constant 0 : index
    %4 = vector.load %arg4[%c0_2, %c0_3] : memref<128x128xi8, #tpu.memory_space<vmem>>, vector<128x128xi8>
    %5 = arith.sitofp %4 : vector<128x128xi8> to vector<128x128xbf16>
    %c0_4 = arith.constant 0 : index
    %c0_5 = arith.constant 0 : index
    %6 = vector.load %arg5[%c0_4, %c0_5] : memref<128x128xbf16, #tpu.memory_space<vmem>>, vector<128x128xbf16>
    %cst = arith.constant dense<0.000000e+00> : vector<128x128xf32>
    %7 = tpu.matmul %5, %6, %cst {dimension_numbers = #tpu.dot_dimension_numbers<[1], [0], [0], [1], [0, 0, 1, 1], [], []>} : vector<128x128xbf16>, vector<128x128xbf16>, vector<128x128xf32> -> vector<128x128xf32>
    %8 = arith.addf %3, %7 : vector<128x128xf32>
    %c0_6 = arith.constant 0 : index
    %c0_7 = arith.constant 0 : index
    %9 = vector.load %arg6[%c0_6, %c0_7] : memref<128x128xf32, #tpu.memory_space<vmem>>, vector<128x128xf32>
    tpu.vector_store %arg6[%c0_6, %c0_7], %8 {strides = array<i32>} : memref<128x128xf32, #tpu.memory_space<vmem>>, vector<128x128xf32>,
    %c0_i32_8 = arith.constant 0 : i32
    %10 = arith.cmpi eq, %arg2, %c0_i32_8 : i32
    %11 = arith.extui %10 : i1 to i32
    %c0_i32_9 = arith.constant 0 : i32
    %12 = arith.cmpi ne, %11, %c0_i32_9 : i32
    scf.if %12 {
      %c0_10 = arith.constant 0 : index
      %c0_11 = arith.constant 0 : index
      %13 = vector.load %arg6[%c0_10, %c0_11] : memref<128x128xf32, #tpu.memory_space<vmem>>, vector<128x128xf32>
      %c0_12 = arith.constant 0 : index
      %14 = memref.load %arg3[%c0_12] : memref<1xf32, #tpu.memory_space<smem>>
      %15 = vector.broadcast %14 : f32 to vector<128x128xf32>
      %16 = arith.addf %13, %15 : vector<128x128xf32>
      %c0_13 = arith.constant 0 : index
      %c0_14 = arith.constant 0 : index
      %17 = vector.load %arg6[%c0_13, %c0_14] : memref<128x128xf32, #tpu.memory_space<vmem>>, vector<128x128xf32>
      tpu.vector_store %arg6[%c0_13, %c0_14], %16 {strides = array<i32>} : memref<128x128xf32, #tpu.memory_space<vmem>>, vector<128x128xf32>,
    } else {
    }
    return
  }
  func.func @transform_0(%arg0: i32, %arg1: i32, %arg2: i32, %arg3: memref<1xf32, #tpu.memory_space<smem>>) -> (i32, i32) {
    %c0_i32 = arith.constant 0 : i32
    return %arg0, %arg2 : i32, i32
  }
  func.func @transform_1(%arg0: i32, %arg1: i32, %arg2: i32, %arg3: memref<1xf32, #tpu.memory_space<smem>>) -> (i32, i32) {
    %c0_i32 = arith.constant 0 : i32
    return %arg2, %arg1 : i32, i32
  }
  func.func @transform_2(%arg0: i32, %arg1: i32, %arg2: i32, %arg3: memref<1xf32, #tpu.memory_space<smem>>) -> (i32, i32) {
    %c0_i32 = arith.constant 0 : i32
    return %arg0, %arg1 : i32, i32
  }
}

</mosaic_0001>

<bundles_post_ra>
// kernel: tpu_custom_call.1
= control target key start
LH: loop header
LB: loop body
LE: loop exit
PB: predicated region body
PF: predicated region fallthrough
CT: control target
= control target key end

     0   :  { %9 = vsyncpa [#allocation5], 0  ;;  %s554_s0 = inlined_call_operand.<no memory space> [shape: f32[1], index: 0, kind: input, shape index: {}]   ;;  %s555_s1 = inlined_call_operand.hbm [shape: s8[128,128], index: 1, kind: input, shape index: {}]   ;;  %s556_s2 = inlined_call_operand.hbm [shape: bf16[128,128], index: 2, kind: input, shape index: {}]   ;;  %s557_s3 = inlined_call_operand.hbm [shape: f32[128,128], index: 3, kind: output, shape index: {}]  }
   0x1   :  { %10 = vsyncpa [#allocation8], 0 }
   0x2   :  { %11 = vsyncpa [#allocation6], 0  ;;  %s509_s12 = smov [#allocation4]  }
   0x3   :  { %s17_s13 = sshll.u32 %s509_s12, 4  ;;  %s18_s13 = int_to_ptr.vmem [resolvable:$true] %s17_s13 }
   0x4   :  { %s451_s14 = scalar_lea.vmem %s18_s13, 512  ;;  %p456_p1 = scmp.lt.s32.totalorder %s18_s13, %s18_s13 }
   0x5   :  { %p452_p0 = scmp.ne.s32.totalorder %s18_s13, %s451_s14  ;;  %p457_p2 = scmp.lt.s32.totalorder %s451_s14, %s451_s14 }
   0x7   :  { %p458_p3 = por %p457_p2, %p456_p1 }
   0x9   :  { %p459_p4 = pnand %p458_p3, %p452_p0 }
   0xb   :  { %462 = shalt.err (!%p459_p4)
}
   0xc   :  { %s510_s15 = smov 128   ;;  %s511_s16 = smov 8  }
   0xd   :  { %23 = dma.hbm_to_vmem [thread:$0]  %s555_s1, 512, %s18_s13, [#allocation5], %s510_s15, %s510_s15, %s511_s16  }
   0xe   :  { %s512_s19 = smov [#allocation7]  }
   0xf   :  { %s29_s20 = sshll.u32 %s512_s19, 4  ;;  %s30_s20 = int_to_ptr.vmem [resolvable:$true] %s29_s20 }
  0x10   :  { %s471_s21 = scalar_lea.vmem %s30_s20, 1024  ;;  %p476_p6 = scmp.lt.s32.totalorder %s30_s20, %s30_s20 }
  0x11   :  { %p472_p5 = scmp.ne.s32.totalorder %s30_s20, %s471_s21  ;;  %p477_p7 = scmp.lt.s32.totalorder %s471_s21, %s471_s21 }
  0x13   :  { %p478_p8 = por %p477_p7, %p476_p6 }
  0x15   :  { %p479_p9 = pnand %p478_p8, %p472_p5 }
  0x17   :  { %482 = shalt.err (!%p479_p9)
}
  0x18   :  { %s513_s22 = smov 64   ;;  %s514_s23 = smov 4  }
  0x19   :  { %35 = dma.hbm_to_vmem [thread:$0]  %s556_s2, 1024, %s30_s20, [#allocation8], %s513_s22, %s513_s22, %s514_s23  }
  0x1a   :  { %503 = dma.done.wait [#allocation5], 512  }
  0x1b   :  { %504 = vsyncadd [#allocation5], 4294966784 }
  0x1c   :  { %505 = dma.done.wait [#allocation8], 1024  }
  0x1d   :  { %506 = vsyncadd [#allocation8], 4294966272  ;;  %v435_v0 = vld [vmem:[#allocation7 + $0x38] sm:$0xff]   ;;  %v436_v1 = vld [vmem:[#allocation7 + $0x30] sm:$0xff]   ;;  %v304_v21 = vstv %s554_s0  ;;  %s515_s0 = smov [#allocation9]  }
  0x1e   :  { %379 = vmatprep.subr.bf16.mxu0 %v435_v0  ;;  %411 = vmatprep.subr.bf16.mxu1 %v435_v0  ;;  %v437_v2 = vld [vmem:[#allocation7 + $0x28] sm:$0xff]   ;;  %v438_v3 = vld [vmem:[#allocation7 + $0x20] sm:$0xff]   ;;  %v81_v5 = vld [vmem:[#allocation4 + $0x10] sm:$0xff]  ;;  %s342_s26 = sshll.u32 %s515_s0, 4  ;;  %s343_s26 = int_to_ptr.vmem [resolvable:$true] %s342_s26 }
  0x1f   :  { %380 = vmatpush3.bf16.msra.mxu0 %v435_v0  ;;  %419 = vmatpush3.bf16.msra.mxu1 %v435_v0  ;;  %v79_v4 = vld [vmem:[#allocation4] sm:$0xff]  ;;  %v87_v7 = vunpack.c.l.s8.bf16 %v81_v5  ;;  %v439_v8 = vld [vmem:[#allocation7 + $0x18] sm:$0xff]   ;;  %v440_v9 = vld [vmem:[#allocation7 + $0x10] sm:$0xff]   ;;  %v88_v15 = vunpack.c.h.s8.bf16 %v81_v5  ;;  %s483_s27 = scalar_lea.vmem %s343_s26, 2048  ;;  %p488_p11 = scmp.lt.s32.totalorder %s343_s26, %s343_s26 }
  0x20   :  { %381 = vmatprep.subr.bf16.mxu0 %v436_v1  ;;  %412 = vmatprep.subr.bf16.mxu1 %v436_v1  ;;  %v83_v6 = vunpack.c.l.s8.bf16 %v79_v4  ;;  %v441_v10 = vld [vmem:[#allocation7 + $0x8] sm:$0xff]   ;;  %v442_v11 = vld [vmem:[#allocation7] sm:$0xff]   ;;  %v82_v13 = vld [vmem:[#allocation4 + $0x18] sm:$0xff]  ;;  %v84_v14 = vunpack.c.h.s8.bf16 %v79_v4  ;;  %p484_p10 = scmp.ne.s32.totalorder %s343_s26, %s483_s27  ;;  %p489_p12 = scmp.lt.s32.totalorder %s483_s27, %s483_s27 }
  0x21   :  { %403 = vmatprep.mubr.bf16.mxu1 %v87_v7  ;;  %v80_v12 = vld [vmem:[#allocation4 + $0x8] sm:$0xff]  ;;  %v89_v17 = vunpack.c.l.s8.bf16 %v82_v13  ;;  %v90_v19 = vunpack.c.h.s8.bf16 %v82_v13 }
  0x22   :  { %395 = vmatprep.mubr.bf16.mxu0 %v83_v6  ;;  %v85_v16 = vunpack.c.l.s8.bf16 %v80_v12  ;;  %v86_v18 = vunpack.c.h.s8.bf16 %v80_v12  ;;  %p490_p13 = por %p489_p12, %p488_p11 }
  0x23   :  { %382 = vmatpush3.bf16.msra.mxu0 %v436_v1  ;;  %420 = vmatpush3.bf16.msra.mxu1 %v436_v1 }
  0x24   :  { %383 = vmatprep.subr.bf16.mxu0 %v437_v2  ;;  %413 = vmatprep.subr.bf16.mxu1 %v437_v2  ;;  %p491_p0 = pnand %p490_p13, %p484_p10 }
  0x27   :  { %384 = vmatpush3.bf16.msra.mxu0 %v437_v2  ;;  %421 = vmatpush3.bf16.msra.mxu1 %v437_v2 }
  0x28   :  { %385 = vmatprep.subr.bf16.mxu0 %v438_v3  ;;  %414 = vmatprep.subr.bf16.mxu1 %v438_v3 }
  0x2b   :  { %386 = vmatpush3.bf16.msra.mxu0 %v438_v3  ;;  %422 = vmatpush3.bf16.msra.mxu1 %v438_v3 }
  0x2c   :  { %387 = vmatprep.subr.bf16.mxu0 %v439_v8  ;;  %415 = vmatprep.subr.bf16.mxu1 %v439_v8 }
  0x2f   :  { %388 = vmatpush3.bf16.msra.mxu0 %v439_v8  ;;  %423 = vmatpush3.bf16.msra.mxu1 %v439_v8 }
  0x30   :  { %389 = vmatprep.subr.bf16.mxu0 %v440_v9  ;;  %416 = vmatprep.subr.bf16.mxu1 %v440_v9 }
  0x33   :  { %390 = vmatpush3.bf16.msra.mxu0 %v440_v9  ;;  %424 = vmatpush3.bf16.msra.mxu1 %v440_v9 }
  0x34   :  { %391 = vmatprep.subr.bf16.mxu0 %v441_v10  ;;  %417 = vmatprep.subr.bf16.mxu1 %v441_v10 }
  0x37   :  { %392 = vmatpush3.bf16.msra.mxu0 %v441_v10  ;;  %425 = vmatpush3.bf16.msra.mxu1 %v441_v10 }
  0x38   :  { %393 = vmatprep.subr.bf16.mxu0 %v442_v11  ;;  %418 = vmatprep.subr.bf16.mxu1 %v442_v11 }
  0x3b   :  { %394 = vmatpush3.bf16.msra.mxu0 %v442_v11  ;;  %426 = vmatpush3.bf16.msra.mxu1 %v442_v11 }
  0x3e   :  { %396 = vmatmul.mubr.bf16.vlgmr.msra.gmra.mxu0 %v84_v14  ;;  %404 = vmatmul.mubr.bf16.vlgmr.msra.gmra.mxu1 %v88_v15 }
  0x3f   :  { %399 = vmatprep.mubr.bf16.mxu0 %v85_v16  ;;  %407 = vmatprep.mubr.bf16.mxu1 %v89_v17 }
  0x46   :  { %400 = vmatmul.mubr.bf16.gmra.mxu0 %v86_v18  ;;  %408 = vmatmul.mubr.bf16.gmra.mxu1 %v90_v19 }
  0xfe   :  { %v397_v20 = vpop.f32.mrf.mxu0  ;;  %v405_v22 = vpop.f32.mrf.mxu1 }
  0xff   :  { %v307_v25 = vadd.f32 %v397_v20, %v304_v21  ;;  %v315_v26 = vadd.f32 %v405_v22, %v304_v21 }
 0x100   :  { %v189_v23 = vpop.f32.mrf.mxu0  ;;  %v221_v24 = vpop.f32.mrf.mxu1 }
 0x101   :  { %323 = vst [vmem:[#allocation9 + $0x10] sm:$0xff] %v307_v25  ;;  %331 = vst [vmem:[#allocation9 + $0x50] sm:$0xff] %v315_v26  ;;  %v305_v29 = vadd.f32 %v304_v21, %v189_v23  ;;  %v313_v30 = vadd.f32 %v304_v21, %v221_v24 }
 0x102   :  { %v398_v27 = vpop.f32.mrf.mxu0  ;;  %v406_v28 = vpop.f32.mrf.mxu1 }
 0x103   :  { %321 = vst [vmem:[#allocation9] sm:$0xff] %v305_v29  ;;  %329 = vst [vmem:[#allocation9 + $0x40] sm:$0xff] %v313_v30  ;;  %v308_v33 = vadd.f32 %v398_v27, %v304_v21  ;;  %v316_v34 = vadd.f32 %v406_v28, %v304_v21 }
 0x104   :  { %v192_v31 = vpop.f32.mrf.mxu0  ;;  %v224_v32 = vpop.f32.mrf.mxu1 }
 0x105   :  { %324 = vst [vmem:[#allocation9 + $0x18] sm:$0xff] %v308_v33  ;;  %332 = vst [vmem:[#allocation9 + $0x58] sm:$0xff] %v316_v34  ;;  %v306_v37 = vadd.f32 %v304_v21, %v192_v31  ;;  %v314_v38 = vadd.f32 %v304_v21, %v224_v32 }
 0x106   :  { %v401_v35 = vpop.f32.mrf.mxu0  ;;  %v409_v36 = vpop.f32.mrf.mxu1 }
 0x107   :  { %322 = vst [vmem:[#allocation9 + $0x8] sm:$0xff] %v306_v37  ;;  %330 = vst [vmem:[#allocation9 + $0x48] sm:$0xff] %v314_v38  ;;  %v311_v41 = vadd.f32 %v401_v35, %v304_v21  ;;  %v319_v42 = vadd.f32 %v409_v36, %v304_v21 }
 0x108   :  { %v205_v39 = vpop.f32.mrf.mxu0  ;;  %v237_v40 = vpop.f32.mrf.mxu1 }
 0x109   :  { %327 = vst [vmem:[#allocation9 + $0x30] sm:$0xff] %v311_v41  ;;  %335 = vst [vmem:[#allocation9 + $0x70] sm:$0xff] %v319_v42  ;;  %v309_v45 = vadd.f32 %v304_v21, %v205_v39  ;;  %v317_v46 = vadd.f32 %v304_v21, %v237_v40 }
 0x10a   :  { %v402_v43 = vpop.f32.mrf.mxu0  ;;  %v410_v44 = vpop.f32.mrf.mxu1 }
 0x10b   :  { %325 = vst [vmem:[#allocation9 + $0x20] sm:$0xff] %v309_v45  ;;  %333 = vst [vmem:[#allocation9 + $0x60] sm:$0xff] %v317_v46  ;;  %v312_v49 = vadd.f32 %v402_v43, %v304_v21  ;;  %v320_v50 = vadd.f32 %v410_v44, %v304_v21 }
 0x10c   :  { %v208_v47 = vpop.f32.mrf.mxu0  ;;  %v240_v48 = vpop.f32.mrf.mxu1 }
 0x10d   :  { %328 = vst [vmem:[#allocation9 + $0x38] sm:$0xff] %v312_v49  ;;  %336 = vst [vmem:[#allocation9 + $0x78] sm:$0xff] %v320_v50  ;;  %v310_v51 = vadd.f32 %v304_v21, %v208_v47  ;;  %v318_v52 = vadd.f32 %v304_v21, %v240_v48 }
 0x10f   :  { %326 = vst [vmem:[#allocation9 + $0x28] sm:$0xff] %v310_v51  ;;  %334 = vst [vmem:[#allocation9 + $0x68] sm:$0xff] %v318_v52 }
 0x110   :  { %494 = shalt.err (!%p491_p0)
}
 0x111   :  { %348 = dma.vmem_to_hbm [thread:$0]  %s343_s26, 2048, %s557_s3, [#allocation6], %s510_s15, %s510_s15, %s511_s16  }
 0x112   :  { %507 = dma.done.wait [#allocation6], 2048  }
 0x113   :  { %508 = vsyncadd [#allocation6], 4294965248 }
 0x114   :  { %352 = vsyncpa [#allocation5], 1 }
 0x115   :  { %353 = vsyncpa [#allocation8], 1 }
 0x116   :  { %354 = vsyncpa [#allocation6], 1 }

</bundles_post_ra>
